<compile_context>
chip_gen: v7x
topology: tpu7x:2x2x1
jax: 0.10.0
libtpu: 0.0.40
codegen_flags: <defaults>
</compile_context>

<pallas_src>
import functools
import math

import jax
import jax.numpy as jnp
from jax import lax
from jax.experimental import pallas as pl
from jax.experimental.pallas import tpu as pltpu


# ----------------------------- activations ----------------------------------
_ACT_FNS = {
    "identity": lambda x: x,
    "relu": lambda x: jnp.maximum(x, 0),
    "tanh": jnp.tanh,
    "sigmoid": jax.nn.sigmoid,
    "softplus": jax.nn.softplus,
}
# "cheap" -> applied in native dtype on the VPU; "transcendental" -> f32 EUP path.
_ACT_KIND = {
    "identity": "identity",
    "relu": "cheap",
    "tanh": "transcendental",
    "sigmoid": "transcendental",
    "softplus": "transcendental",
}


def _resolve_activation(act):
    """Return (kind, fn). Accepts a name or a callable (like the torch module)."""
    if callable(act):
        # Unknown callable: run it on the safe f32 path (correct, maybe slower).
        return ("transcendental", act)
    return (_ACT_KIND[act], _ACT_FNS[act])


# ------------------------------- kernel --------------------------------------
def _split_heads_kernel(flat_ref, out_ref, *, narrow_params, acts, true_f, fold):
    """One fused lane-dense tile: load once, masked-select activations, store once.

    flat_ref / out_ref : (TB, W) VMEM tiles of the folded array, W = fold * true_f.
    Column j of the folded layout corresponds to original column (j % true_f).
    """
    x = flat_ref[...]

    nonidentity = [
        (np_, kind, fn)
        for np_, (kind, fn) in zip(narrow_params, acts)
        if kind != "identity"
    ]
    if not nonidentity:
        out_ref[...] = x.astype(out_ref.dtype)
        return

    # Column index -> original feature index (hoisted once per tile).
    col = lax.broadcasted_iota(jnp.int32, x.shape, dimension=1)
    if fold > 1:
        col = col % true_f

    need_f32 = any(kind == "transcendental" for _, kind, _ in nonidentity)
    x_f32 = x.astype(jnp.float32) if need_f32 else None

    result = x  # identity heads pass through untouched
    for (start, length), kind, fn in nonidentity:
        mask = (col >= start) & (col < start + length)
        if kind == "cheap":
            val = fn(x)                            # native dtype (bf16 OK on v6e/v7x)
        else:
            val = fn(x_f32).astype(x.dtype)        # transcendental in f32 (v5e safe)
        result = jnp.where(mask, val, result)

    out_ref[...] = result.astype(out_ref.dtype)    # single unmasked full-width store


# --------------------------- layout / tiling helpers --------------------------
def _sublane_packing(dtype):
    itemsize = jnp.dtype(dtype).itemsize
    return 8 * max(1, 4 // max(itemsize, 1))       # 8 f32 / 16 bf16 / 32 int8


def _fold_factor(B, F):
    """Smallest r such that (r*F) % 128 == 0 and r divides B; 1 if impossible."""
    if F % 128 == 0:
        return 1
    r = 128 // math.gcd(F, 128)
    k = r
    while k <= B:
        if B % k == 0:
            return k
        k += r
    return 1


def _choose_block_rows(Bf, W, dtype):
    """Byte-based tile sizing on the folded layout.

    Target ~4 MiB per tile (=> ~16 MiB double-buffered in+out working set:
    safe on v7x's 64 MiB VMEM, in the measured ~85% roofline plateau on
    v5e/v6e), packing-aligned, >=4 grid steps when there is enough work.
    """
    itemsize = jnp.dtype(dtype).itemsize
    packing = _sublane_packing(dtype)
    row_bytes = W * itemsize
    total_bytes = Bf * row_bytes
    target_tile_bytes = 4 << 20

    if total_bytes <= target_tile_bytes or Bf <= packing:
        return Bf                                   # single full-extent tile (legal)

    rows = max(packing, ((target_tile_bytes // row_bytes) // packing) * packing)
    if total_bytes >= (8 << 20):
        # Enough work to amortize per-step overhead: ensure >=4 grid steps so
        # the "parallel" axis can shard across both TensorCores (v7x).
        quarter = max(packing, ((Bf // 4) // packing) * packing)
        rows = min(rows, quarter)
    rows = min(rows, Bf)

    # Prefer a divisor of Bf near the cap (no masked tail); otherwise keep the
    # packing-aligned cap and let Pallas mask the tail block (legal + correct).
    bb = rows
    while bb >= max(packing, rows // 2):
        if Bf % bb == 0:
            return bb
        bb -= packing
    return rows
    # NOTE: for extremely wide F (per-row bytes >> 4 MiB) a second 128-aligned
    # column grid axis would keep tiles from collapsing to `packing` rows; not
    # needed for the small-F regimes this module targets.


# ------------------------------- wrapper --------------------------------------
def split_into_many_heads(
    flat_outputs,
    output_sizes,
    output_activations=None,
    *,
    block_rows=None,
    force_pallas=False,
    return_fused=False,
):
    """JAX/Pallas equivalent of SplitIntoManyHeads.forward.

    flat_outputs: (B, F) array with F == sum(output_sizes).
    Returns a tuple of arrays, head i has shape (B, output_sizes[i]).
    With return_fused=True, returns (fused (B, F) array, ((start, len), ...))
    so consumers inside the same jit can slice without an extra HBM pass.
    """
    if output_activations is None:
        output_activations = tuple("identity" for _ in output_sizes)
    if len(output_activations) != len(output_sizes):
        raise ValueError("output_activation and output_sizes must have the same length")

    B, F = flat_outputs.shape
    if F != sum(output_sizes):
        raise ValueError("feature dim must equal sum(output_sizes)")

    # Static narrow params, same as the torch module's __init__.
    narrow_params = []
    start = 0
    for size in output_sizes:
        narrow_params.append((start, size))
        start += size
    narrow_params = tuple(narrow_params)
    acts = tuple(_resolve_activation(a) for a in output_activations)

    dtype = flat_outputs.dtype
    itemsize = jnp.dtype(dtype).itemsize
    total_bytes = B * F * itemsize

    # Tiny-input fast path: launch + ~0.35us/step overhead dwarfs the work.
    if not force_pallas and total_bytes < (256 << 10):
        outs = tuple(
            fn(flat_outputs[:, s : s + l]).astype(dtype)
            for (s, l), (_, fn) in zip(narrow_params, acts)
        )
        if return_fused:
            return jnp.concatenate(outs, axis=1), narrow_params
        return outs

    # ---- lane densification: fold rows into columns so last dim % 128 == 0 ----
    fold = _fold_factor(B, F)
    Bf, W = B // fold, F * fold
    x = flat_outputs.reshape(Bf, W) if fold > 1 else flat_outputs

    packing = _sublane_packing(dtype)
    if block_rows is None:
        block_rows = _choose_block_rows(Bf, W, dtype)
    else:
        block_rows = min(int(block_rows), Bf)
        if block_rows < Bf:
            block_rows = max(packing, (block_rows // packing) * packing)

    num_tiles = pl.cdiv(Bf, block_rows)

    kernel = functools.partial(
        _split_heads_kernel,
        narrow_params=narrow_params,
        acts=acts,
        true_f=F,
        fold=fold,
    )

    # Only raise the scoped-VMEM limit if the (double-buffered in+out) working
    # set actually needs it; stay within v7x's 64 MiB physical VMEM.
    est_working = 4 * block_rows * W * itemsize
    cp_kwargs = dict(dimension_semantics=("parallel",))
    if est_working > (24 << 20):
        cp_kwargs["vmem_limit_bytes"] = int(min(64 << 20, est_working + (8 << 20)))

    fused = pl.pallas_call(
        kernel,
        out_shape=jax.ShapeDtypeStruct((Bf, W), dtype),
        grid_spec=pltpu.PrefetchScalarGridSpec(
            num_scalar_prefetch=0,
            grid=(num_tiles,),
            in_specs=[pl.BlockSpec((block_rows, W), lambda i: (i, 0))],
            out_specs=pl.BlockSpec((block_rows, W), lambda i: (i, 0)),
        ),
        compiler_params=pltpu.CompilerParams(**cp_kwargs),
    )(x)

    fused = fused.reshape(B, F) if fold > 1 else fused

    if return_fused:
        return fused, narrow_params
    # Per-head split: free static slices when fused into consumers by XLA;
    # use return_fused=True to avoid any chance of an extra HBM pass.
    return tuple(fused[:, s : s + l] for (s, l) in narrow_params)


# ------------------------------ reference ------------------------------------
def split_into_many_heads_ref(flat_outputs, output_sizes, output_activations):
    outs = []
    start = 0
    for size, act in zip(output_sizes, output_activations):
        head = flat_outputs[:, start : start + size]
        outs.append(_resolve_activation(act)[1](head))
        start += size
    return tuple(outs)


# --------------------------------- main ---------------------------------------
if __name__ == "__main__":
    key = jax.random.PRNGKey(0)

    # Module config (deterministic, in-script): 3 heads.
    output_sizes = (8, 16, 8)                    # F = 32
    output_activations = ("identity", "relu", "tanh")

    batch = 64
    F = sum(output_sizes)
    flat = jax.random.normal(key, (batch, F), dtype=jnp.float32)

    # Pallas path, auto tiling: fold 4 -> lane-dense (16, 128), single tile.
    outs = jax.block_until_ready(
        split_into_many_heads(
            flat, output_sizes, output_activations, force_pallas=True
        )
    )
    # Pallas path, explicit multi-step grid over folded rows (2 steps x 8 rows)
    # to exercise pipelining / the parallel grid axis.
    outs_tiled = jax.block_until_ready(
        split_into_many_heads(
            flat, output_sizes, output_activations, force_pallas=True, block_rows=8
        )
    )
    # Default path (tiny-input jnp fast path) for parity.
    outs_fast = split_into_many_heads(flat, output_sizes, output_activations)

    refs = split_into_many_heads_ref(flat, output_sizes, output_activations)
    for o, t, f_, r in zip(outs, outs_tiled, outs_fast, refs):
        assert o.shape == r.shape, (o.shape, r.shape)
        assert jnp.allclose(o, r, atol=1e-6, rtol=1e-6), "mismatch (auto tile)"
        assert jnp.allclose(t, r, atol=1e-6, rtol=1e-6), "mismatch (tiled)"
        assert jnp.allclose(f_, r, atol=1e-6, rtol=1e-6), "mismatch (fast path)"

    print("KERNEL_OK")
</pallas_src>

<mosaic_0001>
module attributes {stable_mosaic.version = 11 : i64} {
  func.func @_split_heads_kernel(%arg0: i32, %arg1: memref<16x128xf32, #tpu.memory_space<vmem>>, %arg2: memref<16x128xf32, #tpu.memory_space<vmem>>) attributes {dimension_semantics = [#tpu.dimension_semantics<parallel>], iteration_bounds = array<i64: 1>, scalar_prefetch = 0 : i64, scratch_operands = 0 : i64, tpu.core_type = #tpu.core_type<tc>, window_params = [{transform_indices = @transform_0, window_bounds = array<i64: 16, 128>}, {transform_indices = @transform_1, window_bounds = array<i64: 16, 128>}]} {
    %c0 = arith.constant 0 : index
    %c0_0 = arith.constant 0 : index
    %0 = vector.load %arg1[%c0, %c0_0] : memref<16x128xf32, #tpu.memory_space<vmem>>, vector<16x128xf32>
    %1 = tpu.iota {dimensions = array<i32: 1>} : vector<16x128xi32>
    %c32_i32 = arith.constant 32 : i32
    %c0_i32 = arith.constant 0 : i32
    %2 = arith.cmpi eq, %c32_i32, %c0_i32 : i32
    %c1_i32 = arith.constant 1 : i32
    %3 = arith.select %2, %c1_i32, %c32_i32 : i32
    %4 = vector.broadcast %3 : i32 to vector<16x128xi32>
    %5 = arith.remsi %1, %4 : vector<16x128xi32>
    %c0_i32_1 = arith.constant 0 : i32
    %6 = vector.broadcast %c0_i32_1 : i32 to vector<16x128xi32>
    %7 = arith.cmpi ne, %5, %6 : vector<16x128xi32>
    %c0_i32_2 = arith.constant 0 : i32
    %8 = vector.broadcast %c0_i32_2 : i32 to vector<16x128xi32>
    %9 = arith.cmpi slt, %5, %8 : vector<16x128xi32>
    %c0_i32_3 = arith.constant 0 : i32
    %10 = arith.cmpi slt, %3, %c0_i32_3 : i32
    %11 = vector.broadcast %10 : i1 to vector<16x128xi1>
    %12 = vector.broadcast %11 : vector<16x128xi1> to vector<16x128xi1>
    %13 = arith.xori %9, %12 : vector<16x128xi1>
    %14 = arith.andi %13, %7 : vector<16x128xi1>
    %15 = vector.broadcast %3 : i32 to vector<16x128xi32>
    %16 = arith.addi %5, %15 : vector<16x128xi32>
    %17 = arith.select %14, %16, %5 : vector<16x128xi1>, vector<16x128xi32>
    %c8_i32 = arith.constant 8 : i32
    %18 = vector.broadcast %c8_i32 : i32 to vector<16x128xi32>
    %19 = arith.cmpi sge, %17, %18 : vector<16x128xi32>
    %c24_i32 = arith.constant 24 : i32
    %20 = vector.broadcast %c24_i32 : i32 to vector<16x128xi32>
    %21 = arith.cmpi slt, %17, %20 : vector<16x128xi32>
    %22 = arith.andi %19, %21 : vector<16x128xi1>
    %cst = arith.constant 0.000000e+00 : f32
    %23 = vector.broadcast %cst : f32 to vector<16x128xf32>
    %24 = arith.maximumf %0, %23 : vector<16x128xf32>
    %25 = arith.select %22, %24, %0 : vector<16x128xi1>, vector<16x128xf32>
    %c24_i32_4 = arith.constant 24 : i32
    %26 = vector.broadcast %c24_i32_4 : i32 to vector<16x128xi32>
    %27 = arith.cmpi sge, %17, %26 : vector<16x128xi32>
    %c32_i32_5 = arith.constant 32 : i32
    %28 = vector.broadcast %c32_i32_5 : i32 to vector<16x128xi32>
    %29 = arith.cmpi slt, %17, %28 : vector<16x128xi32>
    %30 = arith.andi %27, %29 : vector<16x128xi1>
    %31 = math.tanh %0 : vector<16x128xf32>
    %32 = arith.select %30, %31, %25 : vector<16x128xi1>, vector<16x128xf32>
    %c0_6 = arith.constant 0 : index
    %c0_7 = arith.constant 0 : index
    %33 = vector.load %arg2[%c0_6, %c0_7] : memref<16x128xf32, #tpu.memory_space<vmem>>, vector<16x128xf32>
    tpu.vector_store %arg2[%c0_6, %c0_7], %32 {strides = array<i32>} : memref<16x128xf32, #tpu.memory_space<vmem>>, vector<16x128xf32>,
    return
  }
  func.func @transform_0(%arg0: i32) -> (i32, i32) {
    %c0_i32 = arith.constant 0 : i32
    %c0_i32_0 = arith.constant 0 : i32
    return %arg0, %c0_i32 : i32, i32
  }
  func.func @transform_1(%arg0: i32) -> (i32, i32) {
    %c0_i32 = arith.constant 0 : i32
    %c0_i32_0 = arith.constant 0 : i32
    return %arg0, %c0_i32 : i32, i32
  }
}

</mosaic_0001>

<bundles_post_ra>
// kernel: tpu_custom_call.1
= control target key start
LH: loop header
LB: loop body
LE: loop exit
PB: predicated region body
PF: predicated region fallthrough
CT: control target
= control target key end

     0   :  { %6 = vsyncpa [#allocation3], 0  ;;  %s172_s0 = inlined_call_operand.hbm [shape: f32[16,128], index: 0, kind: input, shape index: {}]   ;;  %s173_s1 = inlined_call_operand.hbm [shape: f32[16,128], index: 1, kind: output, shape index: {}]  }
   0x1   :  { %7 = vsyncpa [#allocation4], 0  ;;  %s128_s6 = smov [#allocation2]   ;;  %s80_s10 = scalar_lea.hbm %s172_s0, 256 }
   0x2   :  { %s13_s7 = sshll.u32 %s128_s6, 4  ;;  %p81_p0 = scmp.ne.s32.totalorder %s172_s0, %s80_s10  ;;  %s14_s7 = int_to_ptr.vmem [resolvable:$true] %s13_s7 }
   0x3   :  { %p84_p1 = scmp.lt.u32.totalorder %s80_s10, %s172_s0 }
   0x5   :  { %p86_p2 = pnand %p84_p1, %p81_p0 }
   0x7   :  { %89 = shalt.err (!%p86_p2)
}
   0x8   :  { %s90_s15 = scalar_lea.vmem %s14_s7, 256  ;;  %p95_p4 = scmp.lt.s32.totalorder %s14_s7, %s14_s7 }
   0x9   :  { %p91_p3 = scmp.ne.s32.totalorder %s14_s7, %s90_s15  ;;  %p96_p5 = scmp.lt.s32.totalorder %s90_s15, %s90_s15 }
   0xb   :  { %p97_p6 = por %p96_p5, %p95_p4 }
   0xd   :  { %p98_p7 = pnand %p97_p6, %p91_p3 }
   0xf   :  { %101 = shalt.err (!%p98_p7)
}
  0x10   :  { %s129_s16 = smov 128   ;;  %s130_s17 = smov 8  }
  0x11   :  { %19 = dma.hbm_to_vmem [thread:$0]  %s172_s0, 256, %s14_s7, [#allocation3], %s129_s16, %s129_s16, %s130_s17  }
  0x12   :  { %124 = dma.done.wait [#allocation3], 256  }
  0x13   :  { %125 = vsyncadd [#allocation3], 4294967040  ;;  %v25_v0 = vlaneseq  ;;  %v23_v3 = vld [vmem:[#allocation2] sm:$0xff]  ;;  %v24_v4 = vld [vmem:[#allocation2 + $0x8] sm:$0xff]  ;;  %s131_s20 = smov [#allocation5]  }
  0x14   :  { %76 = vtanh.f32 %v23_v3  ;;  %v42_v5 = vmax.f32 %v23_v3, 0.0  ;;  %v43_v6 = vmax.f32 %v24_v4, 0.0  ;;  %s60_s21 = sshll.u32 %s131_s20, 4  ;;  %s61_s21 = int_to_ptr.vmem [resolvable:$true] %s60_s21 }
  0x15   :  { %v26_v1 = vand.u32 127, %v25_v0  ;;  %78 = vtanh.f32 %v24_v4  ;;  %s102_s0 = scalar_lea.vmem %s61_s21, 256  ;;  %p107_p9 = scmp.lt.s32.totalorder %s61_s21, %s61_s21 }
  0x16   :  { %p103_p8 = scmp.ne.s32.totalorder %s61_s21, %s102_s0  ;;  %p108_p10 = scmp.lt.s32.totalorder %s102_s0, %s102_s0 }
  0x17   :  { %v31_v2 = vand.u32 31, %v26_v1 }
  0x18   :  { %p109_p11 = por %p108_p10, %p107_p9 }
  0x19   :  { %vm39_vm0 = vcmp.ge.s32.totalorder %v31_v2, 8  ;;  %vm40_vm1 = vcmp.lt.s32.totalorder %v31_v2, 24  ;;  %vm46_vm3 = vcmp.ge.s32.totalorder %v31_v2, 24 }
  0x1a   :  { %vm41_vm2 = vmand %vm39_vm0, %vm40_vm1  ;;  %p110_p12 = pnand %p109_p11, %p103_p8 }
  0x1b   :  { %v44_v7 = vsel %vm41_vm2, %v42_v5, %v23_v3  ;;  %v45_v8 = vsel %vm41_vm2, %v43_v6, %v24_v4 }
  0x1e   :  { %v77_v9 = vpop.eup %76 }
  0x1f   :  { %v79_v10 = vpop.eup %78  ;;  %v51_v11 = vsel %vm46_vm3, %v77_v9, %v44_v7 }
  0x20   :  { %53 = vst [vmem:[#allocation5] sm:$0xff] %v51_v11  ;;  %v52_v12 = vsel %vm46_vm3, %v79_v10, %v45_v8 }
  0x21   :  { %54 = vst [vmem:[#allocation5 + $0x8] sm:$0xff] %v52_v12 }
  0x22   :  { %113 = shalt.err (!%p110_p12)
}
  0x23   :  { %s114_s24 = scalar_lea.hbm %s173_s1, 256 }
  0x24   :  { %p115_p13 = scmp.ne.s32.totalorder %s173_s1, %s114_s24  ;;  %p118_p0 = scmp.lt.u32.totalorder %s114_s24, %s173_s1 }
  0x26   :  { %p120_p1 = pnand %p118_p0, %p115_p13 }
  0x28   :  { %123 = shalt.err (!%p120_p1)
}
  0x29   :  { %66 = dma.vmem_to_hbm [thread:$0]  %s61_s21, 256, %s173_s1, [#allocation4], %s129_s16, %s129_s16, %s130_s17  }
  0x2a   :  { %126 = dma.done.wait [#allocation4], 256  }
  0x2b   :  { %127 = vsyncadd [#allocation4], 4294967040 }
  0x2c   :  { %70 = vsyncpa [#allocation3], 1 }
  0x2d   :  { %71 = vsyncpa [#allocation4], 1 }

</bundles_post_ra>
